<compile_context>
chip_gen: v5e
topology: v5e:2x2
jax: 0.10.0
libtpu: 0.0.40
codegen_flags: <defaults>
</compile_context>

<pallas_src>
import functools
import math

import jax
import jax.numpy as jnp
from jax.experimental import pallas as pl
from jax.experimental.pallas import tpu as pltpu


def _round_up(x, m):
    return ((x + m - 1) // m) * m


def _fwd_kernel(n_valid, x_ref, w1_ref, b1_ref, w2_ref, b2_ref,
                y_ref, stats_ref):
    """fc1 -> ReLU -> fc2 -> ReLU for one row tile, plus partial BN stats."""
    x = x_ref[...]

    # fc1 + bias + ReLU (MXU matmul, f32 accumulation; elementwise in f32).
    h = jnp.dot(x, w1_ref[...], preferred_element_type=jnp.float32)
    h = jnp.maximum(h + b1_ref[...], 0.0)

    # F.dropout with p=0.0 is the identity (module default dropout=0.0).
    # TODO(synk): non-zero dropout would need pltpu.prng_random_bits masking.

    # fc2 + bias + ReLU (cast back to the matmul dtype for the MXU).
    y = jnp.dot(h.astype(w2_ref.dtype), w2_ref[...],
                preferred_element_type=jnp.float32)
    y = jnp.maximum(y + b2_ref[...], 0.0)

    # Zero batch-padding rows so they do not pollute the BN statistics
    # (they are sliced away by the wrapper).
    tm, dp = y.shape
    row = jax.lax.broadcasted_iota(jnp.int32, (tm, dp), 0) + pl.program_id(0) * tm
    y = jnp.where(row < n_valid, y, 0.0)

    y_ref[...] = y

    # Per-tile partial statistics: row 0 = sum, row 1 = sum of squares.
    s1 = jnp.sum(y, axis=0, keepdims=True)
    s2 = jnp.sum(y * y, axis=0, keepdims=True)
    stats_ref[...] = jnp.concatenate(
        [s1, s2, jnp.zeros((6, dp), jnp.float32)], axis=0)[None]


def _bn_kernel(y_ref, scale_ref, shift_ref, o_ref):
    """Apply the precomputed BatchNorm affine (lane-dense full-tile store)."""
    o_ref[...] = (y_ref[...] * scale_ref[...] + shift_ref[...]).astype(o_ref.dtype)


def mlp_forward(x, w1, b1, w2, b2, gamma, beta, *,
                matmul_dtype=jnp.bfloat16, eps=1e-5, tm_max=256):
    """x: (..., input_dim); w1: (input_dim, hidden); w2: (hidden, output_dim)."""
    orig_shape = x.shape
    out_dim = w2.shape[1]
    out_dtype = x.dtype
    if x.ndim > 2:                     # BatchNorm1d 3-D path: flatten leading dims
        x = x.reshape(-1, orig_shape[-1])
    n, din = x.shape
    hid = w1.shape[1]

    # Lane-dense padding (features -> multiples of 128) and row tiling.
    din_p = _round_up(din, 128)
    hid_p = _round_up(hid, 128)
    dout_p = _round_up(out_dim, 128)
    tm = tm_max if n >= tm_max else _round_up(max(n, 1), 8)
    n_p = _round_up(n, tm)
    n_tiles = n_p // tm

    f32 = jnp.float32
    mm = matmul_dtype
    x_p = jnp.zeros((n_p, din_p), mm).at[:n, :din].set(x.astype(mm))
    w1_p = jnp.zeros((din_p, hid_p), mm).at[:din, :hid].set(w1.astype(mm))
    w2_p = jnp.zeros((hid_p, dout_p), mm).at[:hid, :out_dim].set(w2.astype(mm))
    b1_p = jnp.zeros((1, hid_p), f32).at[0, :hid].set(b1.astype(f32))
    b2_p = jnp.zeros((1, dout_p), f32).at[0, :out_dim].set(b2.astype(f32))

    itm = jnp.dtype(mm).itemsize
    flops = 2 * n_p * (din_p * hid_p + hid_p * dout_p)
    bytes_accessed = (x_p.size * itm + w1_p.size * itm + w2_p.size * itm
                      + (b1_p.size + b2_p.size) * 4
                      + (n_p * dout_p + n_tiles * 8 * dout_p) * 4)
    cparams = pltpu.CompilerParams(
        dimension_semantics=("parallel",),
        vmem_limit_bytes=32 * 1024 * 1024)   # safe on v7x (64 MiB physical)

    y, stats = pl.pallas_call(
        functools.partial(_fwd_kernel, n),
        out_shape=(jax.ShapeDtypeStruct((n_p, dout_p), f32),
                   jax.ShapeDtypeStruct((n_tiles, 8, dout_p), f32)),
        grid_spec=pltpu.PrefetchScalarGridSpec(
            num_scalar_prefetch=0,
            grid=(n_tiles,),
            in_specs=[
                pl.BlockSpec((tm, din_p), lambda i: (i, 0)),      # streamed
                pl.BlockSpec((din_p, hid_p), lambda i: (0, 0)),   # resident
                pl.BlockSpec((1, hid_p), lambda i: (0, 0)),       # resident
                pl.BlockSpec((hid_p, dout_p), lambda i: (0, 0)),  # resident
                pl.BlockSpec((1, dout_p), lambda i: (0, 0)),      # resident
            ],
            out_specs=[
                pl.BlockSpec((tm, dout_p), lambda i: (i, 0)),
                pl.BlockSpec((1, 8, dout_p), lambda i: (i, 0, 0)),
            ],
        ),
        compiler_params=cparams,
        cost_estimate=pl.CostEstimate(flops=flops, transcendentals=0,
                                      bytes_accessed=bytes_accessed),
    )(x_p, w1_p, b1_p, w2_p, b2_p)

    # PyTorch MLP.batch_norm skips normalization for a single sample / empty.
    if n * out_dim == out_dim or n == 0:
        out = y[:n, :out_dim].astype(out_dtype)
        return out.reshape(orig_shape[:-1] + (out_dim,))

    # Reduce per-tile partials -> full-batch training-mode BN (biased var).
    s = jnp.sum(stats, axis=0)                    # (8, dout_p)
    mean = s[0] / n
    var = s[1] / n - mean * mean
    inv_std = jax.lax.rsqrt(jnp.maximum(var, 0.0) + eps)
    gamma_p = jnp.zeros((1, dout_p), f32).at[0, :out_dim].set(gamma.astype(f32))
    beta_p = jnp.zeros((1, dout_p), f32).at[0, :out_dim].set(beta.astype(f32))
    scale = gamma_p * inv_std[None, :]
    shift = beta_p - mean[None, :] * scale

    out = pl.pallas_call(
        _bn_kernel,
        out_shape=jax.ShapeDtypeStruct((n_p, dout_p), out_dtype),
        grid_spec=pltpu.PrefetchScalarGridSpec(
            num_scalar_prefetch=0,
            grid=(n_tiles,),
            in_specs=[
                pl.BlockSpec((tm, dout_p), lambda i: (i, 0)),
                pl.BlockSpec((1, dout_p), lambda i: (0, 0)),
                pl.BlockSpec((1, dout_p), lambda i: (0, 0)),
            ],
            out_specs=pl.BlockSpec((tm, dout_p), lambda i: (i, 0)),
        ),
        compiler_params=cparams,
    )(y, scale, shift)

    out = out[:n, :out_dim]
    return out.reshape(orig_shape[:-1] + (out_dim,))


def init_params(key, input_dim, hidden_dim, output_dim):
    """Matches MLP.init_weights(): xavier_normal_ weights, bias=0.1,
    BN gamma=1, beta=0.  Weights stored pre-transposed as (in, out)."""
    k1, k2 = jax.random.split(key)

    def xavier_normal(k, fan_in, fan_out):
        std = math.sqrt(2.0 / (fan_in + fan_out))
        return std * jax.random.normal(k, (fan_in, fan_out), dtype=jnp.float32)

    w1 = xavier_normal(k1, input_dim, hidden_dim)
    b1 = jnp.full((hidden_dim,), 0.1, dtype=jnp.float32)
    w2 = xavier_normal(k2, hidden_dim, output_dim)
    b2 = jnp.full((output_dim,), 0.1, dtype=jnp.float32)
    gamma = jnp.ones((output_dim,), dtype=jnp.float32)
    beta = jnp.zeros((output_dim,), dtype=jnp.float32)
    return w1, b1, w2, b2, gamma, beta


def reference_forward(x, w1, b1, w2, b2, gamma, beta,
                      matmul_dtype=jnp.bfloat16, eps=1e-5):
    """Pure-JAX reference with the same bf16-operand / f32-accumulate numerics."""
    mm = matmul_dtype
    h = jnp.dot(x.astype(mm), w1.astype(mm), preferred_element_type=jnp.float32)
    h = jax.nn.relu(h + b1)
    y = jnp.dot(h.astype(mm), w2.astype(mm), preferred_element_type=jnp.float32)
    y = jax.nn.relu(y + b2)
    mean = jnp.mean(y, axis=0, keepdims=True)
    var = jnp.mean((y - mean) ** 2, axis=0, keepdims=True)
    return ((y - mean) * jax.lax.rsqrt(var + eps) * gamma + beta).astype(x.dtype)


if __name__ == "__main__":
    key = jax.random.PRNGKey(0)
    kx, kp = jax.random.split(key)

    batch, input_dim, hidden_dim, output_dim = 8, 16, 32, 16
    x = jax.random.normal(kx, (batch, input_dim), dtype=jnp.float32)
    params = init_params(kp, input_dim, hidden_dim, output_dim)

    out = jax.block_until_ready(mlp_forward(x, *params))
    ref = reference_forward(x, *params)

    assert out.shape == (batch, output_dim)
    assert jnp.allclose(out, ref, atol=2e-3, rtol=2e-3), \
        float(jnp.max(jnp.abs(out - ref)))

    print("KERNEL_OK")
</pallas_src>

<mosaic_0001>
module attributes {stable_mosaic.version = 11 : i64} {
  func.func @_fwd_kernel(%arg0: i32, %arg1: memref<8x128xbf16, #tpu.memory_space<vmem>>, %arg2: memref<128x128xbf16, #tpu.memory_space<vmem>>, %arg3: memref<1x128xf32, #tpu.memory_space<vmem>>, %arg4: memref<128x128xbf16, #tpu.memory_space<vmem>>, %arg5: memref<1x128xf32, #tpu.memory_space<vmem>>, %arg6: memref<8x128xf32, #tpu.memory_space<vmem>>, %arg7: memref<1x8x128xf32, #tpu.memory_space<vmem>>) attributes {dimension_semantics = [#tpu.dimension_semantics<parallel>], iteration_bounds = array<i64: 1>, scalar_prefetch = 0 : i64, scratch_operands = 0 : i64, tpu.core_type = #tpu.core_type<tc>, window_params = [{transform_indices = @transform_0, window_bounds = array<i64: 8, 128>}, {pipeline_mode = #tpu.pipeline_mode<synchronous>, transform_indices = @transform_1, window_bounds = array<i64: 128, 128>}, {pipeline_mode = #tpu.pipeline_mode<synchronous>, transform_indices = @transform_2, window_bounds = array<i64: 1, 128>}, {pipeline_mode = #tpu.pipeline_mode<synchronous>, transform_indices = @transform_3, window_bounds = array<i64: 128, 128>}, {pipeline_mode = #tpu.pipeline_mode<synchronous>, transform_indices = @transform_4, window_bounds = array<i64: 1, 128>}, {transform_indices = @transform_5, window_bounds = array<i64: 8, 128>}, {transform_indices = @transform_6, window_bounds = array<i64: 1, 8, 128>}]} {
    %c0 = arith.constant 0 : index
    %c0_0 = arith.constant 0 : index
    %0 = vector.load %arg1[%c0, %c0_0] : memref<8x128xbf16, #tpu.memory_space<vmem>>, vector<8x128xbf16>
    %c0_1 = arith.constant 0 : index
    %c0_2 = arith.constant 0 : index
    %1 = vector.load %arg2[%c0_1, %c0_2] : memref<128x128xbf16, #tpu.memory_space<vmem>>, vector<128x128xbf16>
    %cst = arith.constant dense<0.000000e+00> : vector<8x128xf32>
    %2 = tpu.matmul %0, %1, %cst {dimension_numbers = #tpu.dot_dimension_numbers<[1], [0], [0], [1], [0, 0, 1, 1], [], []>} : vector<8x128xbf16>, vector<128x128xbf16>, vector<8x128xf32> -> vector<8x128xf32>
    %c0_3 = arith.constant 0 : index
    %c0_4 = arith.constant 0 : index
    %3 = vector.load %arg3[%c0_3, %c0_4] : memref<1x128xf32, #tpu.memory_space<vmem>>, vector<1x128xf32>
    %4 = vector.broadcast %3 : vector<1x128xf32> to vector<8x128xf32>
    %5 = arith.addf %2, %4 : vector<8x128xf32>
    %cst_5 = arith.constant 0.000000e+00 : f32
    %6 = vector.broadcast %cst_5 : f32 to vector<8x128xf32>
    %7 = arith.maximumf %5, %6 : vector<8x128xf32>
    %8 = arith.truncf %7 : vector<8x128xf32> to vector<8x128xbf16>
    %c0_6 = arith.constant 0 : index
    %c0_7 = arith.constant 0 : index
    %9 = vector.load %arg4[%c0_6, %c0_7] : memref<128x128xbf16, #tpu.memory_space<vmem>>, vector<128x128xbf16>
    %cst_8 = arith.constant dense<0.000000e+00> : vector<8x128xf32>
    %10 = tpu.matmul %8, %9, %cst_8 {dimension_numbers = #tpu.dot_dimension_numbers<[1], [0], [0], [1], [0, 0, 1, 1], [], []>} : vector<8x128xbf16>, vector<128x128xbf16>, vector<8x128xf32> -> vector<8x128xf32>
    %c0_9 = arith.constant 0 : index
    %c0_10 = arith.constant 0 : index
    %11 = vector.load %arg5[%c0_9, %c0_10] : memref<1x128xf32, #tpu.memory_space<vmem>>, vector<1x128xf32>
    %12 = vector.broadcast %11 : vector<1x128xf32> to vector<8x128xf32>
    %13 = arith.addf %10, %12 : vector<8x128xf32>
    %cst_11 = arith.constant 0.000000e+00 : f32
    %14 = vector.broadcast %cst_11 : f32 to vector<8x128xf32>
    %15 = arith.maximumf %13, %14 : vector<8x128xf32>
    %16 = tpu.iota {dimensions = array<i32: 0>} : vector<8x128xi32>
    %c8_i32 = arith.constant 8 : i32
    %17 = arith.muli %arg0, %c8_i32 : i32
    %18 = vector.broadcast %17 : i32 to vector<8x128xi32>
    %19 = arith.addi %16, %18 : vector<8x128xi32>
    %c8_i32_12 = arith.constant 8 : i32
    %20 = vector.broadcast %c8_i32_12 : i32 to vector<8x128xi32>
    %21 = arith.cmpi slt, %19, %20 : vector<8x128xi32>
    %cst_13 = arith.constant 0.000000e+00 : f32
    %22 = vector.broadcast %cst_13 : f32 to vector<8x128xf32>
    %23 = arith.select %21, %15, %22 : vector<8x128xi1>, vector<8x128xf32>
    %c0_14 = arith.constant 0 : index
    %c0_15 = arith.constant 0 : index
    %24 = vector.load %arg6[%c0_14, %c0_15] : memref<8x128xf32, #tpu.memory_space<vmem>>, vector<8x128xf32>
    tpu.vector_store %arg6[%c0_14, %c0_15], %23 {strides = array<i32>} : memref<8x128xf32, #tpu.memory_space<vmem>>, vector<8x128xf32>,
    %cst_16 = arith.constant dense<0.000000e+00> : vector<128xf32>
    %25 = vector.multi_reduction <add>, %23, %cst_16 [0] : vector<8x128xf32> to vector<128xf32>
    %26 = vector.shape_cast %25 : vector<128xf32> to vector<1x128xf32>
    %27 = arith.mulf %23, %23 : vector<8x128xf32>
    %cst_17 = arith.constant dense<0.000000e+00> : vector<128xf32>
    %28 = vector.multi_reduction <add>, %27, %cst_17 [0] : vector<8x128xf32> to vector<128xf32>
    %29 = vector.shape_cast %28 : vector<128xf32> to vector<1x128xf32>
    %cst_18 = arith.constant 0.000000e+00 : f32
    %30 = vector.broadcast %cst_18 : f32 to vector<6x128xf32>
    %31 = tpu.concatenate %26, %29, %30 in 0 : vector<1x128xf32>, vector<1x128xf32>, vector<6x128xf32> -> vector<8x128xf32>
    %32 = vector.shape_cast %31 : vector<8x128xf32> to vector<1x8x128xf32>
    %c0_19 = arith.constant 0 : index
    %c0_20 = arith.constant 0 : index
    %c0_21 = arith.constant 0 : index
    %33 = vector.load %arg7[%c0_19, %c0_20, %c0_21] : memref<1x8x128xf32, #tpu.memory_space<vmem>>, vector<1x8x128xf32>
    tpu.vector_store %arg7[%c0_19, %c0_20, %c0_21], %32 {strides = array<i32>} : memref<1x8x128xf32, #tpu.memory_space<vmem>>, vector<1x8x128xf32>,
    return
  }
  func.func @transform_0(%arg0: i32) -> (i32, i32) {
    %c0_i32 = arith.constant 0 : i32
    %c0_i32_0 = arith.constant 0 : i32
    return %arg0, %c0_i32 : i32, i32
  }
  func.func @transform_1(%arg0: i32) -> (i32, i32) {
    %c0_i32 = arith.constant 0 : i32
    %c0_i32_0 = arith.constant 0 : i32
    %c0_i32_1 = arith.constant 0 : i32
    return %c0_i32, %c0_i32_0 : i32, i32
  }
  func.func @transform_2(%arg0: i32) -> (i32, i32) {
    %c0_i32 = arith.constant 0 : i32
    %c0_i32_0 = arith.constant 0 : i32
    %c0_i32_1 = arith.constant 0 : i32
    return %c0_i32, %c0_i32_0 : i32, i32
  }
  func.func @transform_3(%arg0: i32) -> (i32, i32) {
    %c0_i32 = arith.constant 0 : i32
    %c0_i32_0 = arith.constant 0 : i32
    %c0_i32_1 = arith.constant 0 : i32
    return %c0_i32, %c0_i32_0 : i32, i32
  }
  func.func @transform_4(%arg0: i32) -> (i32, i32) {
    %c0_i32 = arith.constant 0 : i32
    %c0_i32_0 = arith.constant 0 : i32
    %c0_i32_1 = arith.constant 0 : i32
    return %c0_i32, %c0_i32_0 : i32, i32
  }
  func.func @transform_5(%arg0: i32) -> (i32, i32) {
    %c0_i32 = arith.constant 0 : i32
    %c0_i32_0 = arith.constant 0 : i32
    return %arg0, %c0_i32 : i32, i32
  }
  func.func @transform_6(%arg0: i32) -> (i32, i32, i32) {
    %c0_i32 = arith.constant 0 : i32
    %c0_i32_0 = arith.constant 0 : i32
    %c0_i32_1 = arith.constant 0 : i32
    return %arg0, %c0_i32, %c0_i32_0 : i32, i32, i32
  }
}

</mosaic_0001>

<bundles_post_ra>
// kernel: tpu_custom_call.1
= control target key start
LH: loop header
LB: loop body
LE: loop exit
PB: predicated region body
PF: predicated region fallthrough
CT: control target
= control target key end

     0   :  { %12 = vsyncpa [#allocation3], 0  ;;  %s575_s0 = inlined_call_operand.hbm [shape: bf16[8,128], index: 0, kind: input, shape index: {}]   ;;  %s576_s1 = inlined_call_operand.hbm [shape: bf16[128,128], index: 1, kind: input, shape index: {}]   ;;  %s577_s2 = inlined_call_operand.vmem [shape: f32[1,128], index: 2, kind: input, shape index: {}]   ;;  %s578_s3 = inlined_call_operand.hbm [shape: bf16[128,128], index: 3, kind: input, shape index: {}]   ;;  %s579_s4 = inlined_call_operand.vmem [shape: f32[1,128], index: 4, kind: input, shape index: {}]   ;;  %s580_s5 = inlined_call_operand.hbm [shape: f32[8,128], index: 5, kind: output, shape index: {0}]   ;;  %s581_s6 = inlined_call_operand.hbm [shape: f32[1,8,128], index: 6, kind: output, shape index: {1}]  }
   0x1   :  { %13 = vsyncpa [#allocation6], 0 }
   0x2   :  { %14 = vsyncpa [#allocation4], 0  ;;  %s31_s23 = sshll.u32 %s576_s1, 4  ;;  %s32_s23 = int_to_ptr.hbm [resolvable:$true] %s31_s23 }
   0x3   :  { %15 = vsyncpa [#allocation10], 0  ;;  %s512_s24 = smov [#allocation5]   ;;  %s21_s28 = sshll.u32 %s575_s0, 4  ;;  %s22_s28 = int_to_ptr.hbm [resolvable:$true] %s21_s28 }
   0x4   :  { %s33_s25 = sshll.u32 %s512_s24, 4  ;;  %s513_s29 = smov 64   ;;  %s34_s25 = int_to_ptr.vmem [resolvable:$true] %s33_s25 }
   0x5   :  { %s514_s30 = smov 4   ;;  %s515_s7 = smov [#allocation2]  }
   0x6   :  { %39 = dma.hbm_to_vmem [thread:$0]  %s32_s23, 1024, %s34_s25, [#allocation6], %s513_s29, %s513_s29, %s514_s30  }
   0x7   :  { %s23_s8 = sshll.u32 %s515_s7, 4  ;;  %s46_s11 = sshll.u32 %s578_s3, 4  ;;  %s24_s8 = int_to_ptr.vmem [resolvable:$true] %s23_s8  ;;  %s47_s11 = int_to_ptr.hbm [resolvable:$true] %s46_s11 }
   0x8   :  { %26 = dma.hbm_to_vmem [thread:$0]  %s22_s28, 64, %s24_s8, [#allocation3]  }
   0x9   :  { %s516_s1 = smov [#allocation7]  }
   0xa   :  { %s48_s12 = sshll.u32 %s516_s1, 4  ;;  %s49_s12 = int_to_ptr.vmem [resolvable:$true] %s48_s12 }
   0xb   :  { %54 = dma.hbm_to_vmem [thread:$0]  %s47_s11, 1024, %s49_s12, [#allocation6], %s513_s29, %s513_s29, %s514_s30  }
   0xc   :  { %504 = dma.done.wait [#allocation3], 64  }
   0xd   :  { %505 = vsyncadd [#allocation3], 4294967232 }
   0xe   :  { %506 = dma.done.wait [#allocation6], 2048  }
   0xf   :  { %507 = vsyncadd [#allocation6], 4294965248  ;;  %v366_v0 = vld [vmem:[#allocation5 + $0x38] sm:$0xff]  ;;  %v365_v1 = vld [vmem:[#allocation5 + $0x30] sm:$0xff]  ;;  %s517_s15 = smov [#allocation8]   ;;  %s268_s19 = sshll.u32 %s580_s5, 4  ;;  %s269_s19 = int_to_ptr.hbm [resolvable:$true] %s268_s19 }
  0x10   :  { %138 = vmatpush.bf16.msra.mxu0 %v366_v0  ;;  %v374_v2 = vld [vmem:[#allocation7 + $0x38] sm:$0xff]  ;;  %v373_v3 = vld [vmem:[#allocation7 + $0x30] sm:$0xff]  ;;  %v364_v4 = vld [vmem:[#allocation5 + $0x28] sm:$0xff]  ;;  %s266_s16 = sshll.u32 %s517_s15, 4  ;;  %vm256_vm0 = vcmask 1040384   ;;  %s279_s21 = sshll.u32 %s581_s6, 4  ;;  %s267_s16 = int_to_ptr.vmem [resolvable:$true] %s266_s16  ;;  %s280_s21 = int_to_ptr.hbm [resolvable:$true] %s279_s21 }
  0x11   :  { %221 = vmatpush.bf16.msra.mxu1 %v374_v2  ;;  %v372_v5 = vld [vmem:[#allocation7 + $0x28] sm:$0xff]  ;;  %v363_v6 = vld [vmem:[#allocation5 + $0x20] sm:$0xff]  ;;  %v362_v8 = vld [vmem:[#allocation5 + $0x18] sm:$0xff]  ;;  %vm258_vm1 = vcmask 1041408  }
  0x12   :  { %v371_v7 = vld [vmem:[#allocation7 + $0x20] sm:$0xff]  ;;  %v370_v9 = vld [vmem:[#allocation7 + $0x18] sm:$0xff]  ;;  %v361_v10 = vld [vmem:[#allocation5 + $0x10] sm:$0xff] }
  0x13   :  { %v369_v11 = vld [vmem:[#allocation7 + $0x10] sm:$0xff]  ;;  %v360_v12 = vld [vmem:[#allocation5 + $0x8] sm:$0xff]  ;;  %v359_v13 = vld [vmem:[#allocation5] sm:$0xff] }
  0x14   :  { %139 = vmatpush.bf16.msra.mxu0 %v365_v1  ;;  %v69_v14 = vld [vmem:[#allocation2] sm:$0xf]  ;;  %v368_v15 = vld [vmem:[#allocation7 + $0x8] sm:$0xff]  ;;  %v367_v16 = vld [vmem:[#allocation7] sm:$0xff] }
  0x15   :  { %222 = vmatpush.bf16.msra.mxu1 %v373_v3  ;;  %v382_v17 = vld [vmem:[%s577_s2] ss:$0 sm:$0xff]  ;;  %s518_s2 = smov [#allocation9]  }
  0x16   :  { %v383_v23 = vld [vmem:[%s579_s4] ss:$0 sm:$0xff]  ;;  %s277_s4 = sshll.u32 %s518_s2, 4  ;;  %s278_s4 = int_to_ptr.vmem [resolvable:$true] %s277_s4 }
  0x18   :  { %140 = vmatpush.bf16.msra.mxu0 %v364_v4 }
  0x19   :  { %223 = vmatpush.bf16.msra.mxu1 %v372_v5 }
  0x1c   :  { %141 = vmatpush.bf16.msra.mxu0 %v363_v6 }
  0x1d   :  { %224 = vmatpush.bf16.msra.mxu1 %v371_v7 }
  0x20   :  { %142 = vmatpush.bf16.msra.mxu0 %v362_v8 }
  0x21   :  { %225 = vmatpush.bf16.msra.mxu1 %v370_v9 }
  0x24   :  { %143 = vmatpush.bf16.msra.mxu0 %v361_v10 }
  0x25   :  { %226 = vmatpush.bf16.msra.mxu1 %v369_v11 }
  0x28   :  { %144 = vmatpush.bf16.msra.mxu0 %v360_v12 }
  0x29   :  { %227 = vmatpush.bf16.msra.mxu1 %v368_v15 }
  0x2c   :  { %145 = vmatpush.bf16.msra.mxu0 %v359_v13 }
  0x2d   :  { %228 = vmatpush.bf16.msra.mxu1 %v367_v16 }
  0x2f   :  { %146 = vmatmul.bf16.vlgmr.msra.gmra.mxu0 %v69_v14 }
  0xac   :  { %v147_v18 = vpop.f32.mrf.mxu0 }
  0xad   :  { %v148_v19 = vadd.f32 %v382_v17, %v147_v18 }
  0xaf   :  { %v151_v20 = vmax.f32 %v148_v19, 0.0 }
  0xb1   :  { %v152_v21 = vpack.c.bf16 %v151_v20, %v151_v20 }
  0xb3   :  { %229 = vmatmul.bf16.vlgmr.msra.gmra.mxu1 %v152_v21 }
  0xb4   :  { %v149_v22 = vpop.f32.mrf.mxu0 }
 0x130   :  { %v230_v24 = vpop.f32.mrf.mxu1 }
 0x131   :  { %v231_v25 = vadd.f32 %v383_v23, %v230_v24 }
 0x133   :  { %v234_v26 = vmax.f32 %v231_v25, 0.0 }
 0x135   :  { %v243_v27 = vrot.slane %v234_v26, 4  ;;  %v249_v28 = vmul.f32 %v234_v26, %v234_v26  ;;  %242 = vst [vmem:[#allocation8] sm:$0xff] %v234_v26 }
 0x136   :  { %271 = dma.vmem_to_hbm [thread:$0]  %s267_s16, 128, %s269_s19, [#allocation4]  }
 0x137   :  { %v244_v29 = vadd.f32 %v243_v27, %v234_v26  ;;  %v250_v30 = vrot.slane %v249_v28, 4 }
 0x138   :  { %v232_v31 = vpop.f32.mrf.mxu1 }
 0x139   :  { %v245_v32 = vrot.slane %v244_v29, 2  ;;  %v251_v33 = vadd.f32 %v250_v30, %v249_v28 }
 0x13b   :  { %v246_v34 = vadd.f32 %v245_v32, %v244_v29  ;;  %v252_v35 = vrot.slane %v251_v33, 2 }
 0x13d   :  { %v247_v36 = vrot.slane %v246_v34, 1  ;;  %v253_v37 = vadd.f32 %v252_v35, %v251_v33 }
 0x13f   :  { %v254_v38 = vrot.slane %v253_v37, 1  ;;  %v248_v39 = vadd.f32 %v247_v36, %v246_v34 }
 0x141   :  { %v255_v40 = vadd.f32 %v254_v38, %v253_v37 }
 0x143   :  { %v257_v41 = vsel %vm256_vm0, %v248_v39, %v255_v40 }
 0x144   :  { %v259_v42 = vsel %vm258_vm1, %v257_v41, 0.0 }
 0x145   :  { %260 = vst [vmem:[#allocation9] sm:$0xff] %v259_v42 }
 0x146   :  { %282 = dma.vmem_to_hbm [thread:$0]  %s278_s4, 128, %s280_s21, [#allocation10]  }
 0x147   :  { %508 = dma.done.wait [#allocation4], 128  }
 0x148   :  { %509 = vsyncadd [#allocation4], 4294967168 }
 0x149   :  { %510 = dma.done.wait [#allocation10], 128  }
 0x14a   :  { %511 = vsyncadd [#allocation10], 4294967168 }
 0x14b   :  { %291 = vsyncpa [#allocation3], 1 }
 0x14c   :  { %292 = vsyncpa [#allocation6], 1 }
 0x14d   :  { %293 = vsyncpa [#allocation4], 1 }
 0x14e   :  { %294 = vsyncpa [#allocation10], 1 }

</bundles_post_ra>
